<compile_context>
chip_gen: v6e
topology: v6e:2x2x1
jax: 0.10.0
libtpu: 0.0.40
codegen_flags: <defaults>
</compile_context>

<pallas_src>
import math
import jax
import jax.numpy as jnp
from jax.experimental import pallas as pl
from jax.experimental.pallas import tpu as pltpu

BN_EPS = 1e-5


def _round_up(n, m):
    return ((n + m - 1) // m) * m


# ---------------------------------------------------------------------------
# Kernel
# ---------------------------------------------------------------------------
def mlp_kernel(x_ref,
               w1_ref, b1_ref,
               w2_ref, b2_ref,
               w3_ref, b3_ref,
               w4_ref, b4_ref,
               o_ref):
    """Fused forward for one batch tile. BN already folded into w2/w3/w4row."""

    def dense_relu(h, w_ref, b_ref):
        # Cast the MXU operands to the weight dtype (bf16 on the fast path); keep
        # f32 accumulation and f32 bias/ReLU.
        z = jnp.dot(h.astype(w_ref.dtype), w_ref[...],
                    preferred_element_type=jnp.float32) + b_ref[...]
        return jnp.maximum(z, 0.0)

    h = x_ref[...]
    h = dense_relu(h, w1_ref, b1_ref)
    h = dense_relu(h, w2_ref, b2_ref)
    h = dense_relu(h, w3_ref, b3_ref)
    # Final layer has output width 1: contract H on both operands so the result is a
    # lane-dense (1, TB) row (unmasked stores), instead of a lane-sparse (TB, 1) column.
    out_row = jnp.einsum("oh,th->ot", w4_ref[...], h.astype(w4_ref.dtype),
                         preferred_element_type=jnp.float32) + b4_ref[...]
    o_ref[...] = out_row.astype(o_ref.dtype)


# ---------------------------------------------------------------------------
# BN -> Linear folding (offline, eval-mode semantics)
# ---------------------------------------------------------------------------
def fold_batchnorm(params, compute_dtype=jnp.bfloat16):
    """Fold eval-mode BatchNorm1d affine into the following Linear layer.

    BN(z) = scale * z + shift, scale = gamma * rsqrt(var + eps),
    shift = beta - mean * scale.  Then
        BN(z) @ W + b = z @ (scale[:, None] * W) + (shift @ W + b).
    Folding is done in f32; only the matmul weights are cast to compute_dtype.
    """
    def scale_shift(bn):
        gamma, beta, rmean, rvar = bn[0], bn[1], bn[2], bn[3]
        scale = gamma / jnp.sqrt(rvar + BN_EPS)
        shift = beta - rmean * scale
        return scale, shift

    s1, t1 = scale_shift(params["bn1"])
    s2, t2 = scale_shift(params["bn2"])
    s3, t3 = scale_shift(params["bn3"])

    w2t = s1[:, None] * params["w2t"]
    b2 = params["b2"] + t1 @ params["w2t"]
    w3t = s2[:, None] * params["w3t"]
    b3 = params["b3"] + t2 @ params["w3t"]
    w4t = s3[:, None] * params["w4t"]                    # (hidden, 1)
    b4 = (params["b4"] + t3 @ params["w4t"]).reshape(1, 1)

    return {
        "w1t": params["w1t"].astype(compute_dtype), "b1": params["b1"],
        "w2t": w2t.astype(compute_dtype), "b2": b2,
        "w3t": w3t.astype(compute_dtype), "b3": b3,
        "w4row": w4t.T.astype(compute_dtype),            # (1, hidden)
        "b4": b4,
    }


# ---------------------------------------------------------------------------
# Wrapper
# ---------------------------------------------------------------------------
def neural_network_forward(x, params, *, block_b=1024, compute_dtype=jnp.bfloat16):
    """x: (B, input_size) float32. params: dict from init_params (unfused)."""
    fused = fold_batchnorm(params, compute_dtype)
    B, in_dim = x.shape

    # Batch tile: one tile if B fits, else a multiple of 128 so the (1, TB) output
    # blocks stay lane-dense (and bf16 sublane packing stays clean on the x tile).
    if B <= block_b:
        TB = _round_up(max(B, 1), 16)
    else:
        TB = _round_up(block_b, 128)
    B_pad = _round_up(B, TB)

    x = x.astype(compute_dtype)
    if B_pad != B:
        x = jnp.pad(x, ((0, B_pad - B), (0, 0)))
    grid = (B_pad // TB,)

    weights = (
        fused["w1t"], fused["b1"],
        fused["w2t"], fused["b2"],
        fused["w3t"], fused["b3"],
        fused["w4row"], fused["b4"],
    )

    # Explicit VMEM budget: (possibly double-buffered) weights + double-buffered x
    # tile + double-buffered out tile + headroom.  Clamp to [32 MiB, 64 MiB] so the
    # request is valid on v5e/v6e (128 MiB physical) and v7x (64 MiB physical) alike.
    wbytes = sum(int(a.size) * a.dtype.itemsize for a in weights)
    xbytes = TB * in_dim * x.dtype.itemsize
    need = 2 * wbytes + 2 * xbytes + 2 * TB * 4 + (4 << 20)
    vmem_limit = int(min(max(need, 32 << 20), 64 << 20))

    def run(single_buffer_weights):
        def const_spec(arr):
            # Whole (small) parameter resident in VMEM, same block every grid step.
            if single_buffer_weights:
                return pl.BlockSpec(arr.shape, lambda i: (0, 0),
                                    pipeline_mode=pl.Buffered(1))
            return pl.BlockSpec(arr.shape, lambda i: (0, 0))

        in_specs = [pl.BlockSpec((TB, in_dim), lambda i: (i, 0))]
        in_specs += [const_spec(a) for a in weights]

        out2d = pl.pallas_call(
            mlp_kernel,
            out_shape=jax.ShapeDtypeStruct((1, B_pad), jnp.float32),
            grid=grid,
            in_specs=in_specs,
            out_specs=pl.BlockSpec((1, TB), lambda i: (0, i)),
            compiler_params=pltpu.CompilerParams(
                dimension_semantics=("parallel",),   # megacore-shardable batch axis
                vmem_limit_bytes=vmem_limit),
        )(x, *weights)
        return jax.block_until_ready(out2d)

    try:
        # Constant-index-map weights never change block -> single-buffer them.
        out2d = run(True)
    except Exception:
        # Fallback: default double-buffered resident weights (always supported).
        out2d = run(False)

    return out2d.reshape(B_pad, 1)[:B].astype(jnp.float32)


# ---------------------------------------------------------------------------
# Parameter init (matches module structure; weights stored pre-transposed)
# ---------------------------------------------------------------------------
def kaiming_uniform(key, shape):
    # init.kaiming_uniform_ defaults: a=0, fan_in mode, leaky_relu gain=sqrt(2)
    fan_in = shape[1]
    bound = math.sqrt(2.0) * math.sqrt(3.0 / fan_in)
    return jax.random.uniform(key, shape, jnp.float32, -bound, bound)


def xavier_uniform(key, shape):
    fan_out, fan_in = shape
    bound = math.sqrt(6.0 / (fan_in + fan_out))
    return jax.random.uniform(key, shape, jnp.float32, -bound, bound)


def init_params(key, input_size, hidden_size):
    k1, k2, k3, k4 = jax.random.split(key, 4)
    # PyTorch Linear weights are (out, in); transpose to (in, out) for the kernel.
    w1 = kaiming_uniform(k1, (hidden_size, input_size))
    w2 = kaiming_uniform(k2, (2 * hidden_size, hidden_size))
    w3 = kaiming_uniform(k3, (hidden_size, 2 * hidden_size))
    w4 = xavier_uniform(k4, (1, hidden_size))

    def bn_params(n):
        # rows: gamma, beta, running_mean, running_var (PyTorch defaults)
        return jnp.stack([jnp.ones((n,), jnp.float32),
                          jnp.zeros((n,), jnp.float32),
                          jnp.zeros((n,), jnp.float32),
                          jnp.ones((n,), jnp.float32)], axis=0)

    return {
        "w1t": w1.T, "b1": jnp.zeros((1, hidden_size), jnp.float32),
        "bn1": bn_params(hidden_size),
        "w2t": w2.T, "b2": jnp.zeros((1, 2 * hidden_size), jnp.float32),
        "bn2": bn_params(2 * hidden_size),
        "w3t": w3.T, "b3": jnp.zeros((1, hidden_size), jnp.float32),
        "bn3": bn_params(hidden_size),
        "w4t": w4.T, "b4": jnp.zeros((1, 1), jnp.float32),
    }


# ---------------------------------------------------------------------------
# Plain-JAX reference (unfused eval-mode forward) for correctness checking
# ---------------------------------------------------------------------------
def reference_forward(x, params):
    def layer(h, wt, b, bn):
        z = jnp.maximum(h @ wt + b, 0.0)
        gamma, beta, rmean, rvar = bn[0], bn[1], bn[2], bn[3]
        return (z - rmean) / jnp.sqrt(rvar + BN_EPS) * gamma + beta

    h = layer(x, params["w1t"], params["b1"], params["bn1"])
    h = layer(h, params["w2t"], params["b2"], params["bn2"])
    h = layer(h, params["w3t"], params["b3"], params["bn3"])
    return h @ params["w4t"] + params["b4"]


if __name__ == "__main__":
    key = jax.random.PRNGKey(0)
    k_x, k_p, k_bn, k_big = jax.random.split(key, 4)

    batch = 8
    input_size = 16
    hidden_size = 32

    x = jax.random.normal(k_x, (batch, input_size), jnp.float32)
    params = init_params(k_p, input_size, hidden_size)
    ref = reference_forward(x, params)

    # Check 1: f32 compute path, module state exactly as after __init__ -> tight check.
    out_f32 = neural_network_forward(x, params, compute_dtype=jnp.float32)
    assert out_f32.shape == (batch, 1)
    assert jnp.allclose(out_f32, ref, atol=1e-4, rtol=1e-4), "f32 mismatch vs reference"

    # Check 2: default bf16 MXU path -> looser tolerance against the f32 reference.
    out_bf16 = neural_network_forward(x, params)
    assert jnp.allclose(out_bf16, ref, atol=1e-1, rtol=5e-2), "bf16 mismatch vs reference"

    # Check 3: non-trivial BN state (as after training) to exercise the BN -> Linear
    # folding, plus a multi-tile grid with batch padding and lane-dense output blocks.
    kb1, kb2, kb3 = jax.random.split(k_bn, 3)

    def rand_bn(k, n):
        kg, kb, km, kv = jax.random.split(k, 4)
        return jnp.stack([
            1.0 + 0.1 * jax.random.normal(kg, (n,), jnp.float32),   # gamma
            0.1 * jax.random.normal(kb, (n,), jnp.float32),         # beta
            0.1 * jax.random.normal(km, (n,), jnp.float32),         # running_mean
            1.0 + 0.5 * jax.random.uniform(kv, (n,), jnp.float32),  # running_var
        ], axis=0)

    params["bn1"] = rand_bn(kb1, hidden_size)
    params["bn2"] = rand_bn(kb2, 2 * hidden_size)
    params["bn3"] = rand_bn(kb3, hidden_size)

    x_big = jax.random.normal(k_big, (200, input_size), jnp.float32)
    out_big = neural_network_forward(x_big, params, block_b=128)   # TB=128, 2 grid steps
    ref_big = reference_forward(x_big, params)
    assert out_big.shape == (200, 1)
    assert jnp.allclose(out_big, ref_big, atol=1e-1, rtol=5e-2), "folded-BN mismatch"

    print("KERNEL_OK")
</pallas_src>

<mosaic_0001>
module attributes {stable_mosaic.version = 11 : i64} {
  func.func @mlp_kernel(%arg0: i32, %arg1: memref<16x16xf32, #tpu.memory_space<vmem>>, %arg2: memref<16x32xf32, #tpu.memory_space<vmem>>, %arg3: memref<1x32xf32, #tpu.memory_space<vmem>>, %arg4: memref<32x64xf32, #tpu.memory_space<vmem>>, %arg5: memref<1x64xf32, #tpu.memory_space<vmem>>, %arg6: memref<64x32xf32, #tpu.memory_space<vmem>>, %arg7: memref<1x32xf32, #tpu.memory_space<vmem>>, %arg8: memref<1x32xf32, #tpu.memory_space<vmem>>, %arg9: memref<1x1xf32, #tpu.memory_space<vmem>>, %arg10: memref<1x16xf32, #tpu.memory_space<vmem>>) attributes {dimension_semantics = [#tpu.dimension_semantics<parallel>], iteration_bounds = array<i64: 1>, scalar_prefetch = 0 : i64, scratch_operands = 0 : i64, tpu.core_type = #tpu.core_type<tc>, window_params = [{transform_indices = @transform_0, window_bounds = array<i64: 16, 16>}, {pipeline_mode = #tpu.pipeline_mode<synchronous>, transform_indices = @transform_1, window_bounds = array<i64: 16, 32>}, {pipeline_mode = #tpu.pipeline_mode<synchronous>, transform_indices = @transform_2, window_bounds = array<i64: 1, 32>}, {pipeline_mode = #tpu.pipeline_mode<synchronous>, transform_indices = @transform_3, window_bounds = array<i64: 32, 64>}, {pipeline_mode = #tpu.pipeline_mode<synchronous>, transform_indices = @transform_4, window_bounds = array<i64: 1, 64>}, {pipeline_mode = #tpu.pipeline_mode<synchronous>, transform_indices = @transform_5, window_bounds = array<i64: 64, 32>}, {pipeline_mode = #tpu.pipeline_mode<synchronous>, transform_indices = @transform_6, window_bounds = array<i64: 1, 32>}, {pipeline_mode = #tpu.pipeline_mode<synchronous>, transform_indices = @transform_7, window_bounds = array<i64: 1, 32>}, {pipeline_mode = #tpu.pipeline_mode<synchronous>, transform_indices = @transform_8, window_bounds = array<i64: 1, 1>}, {transform_indices = @transform_9, window_bounds = array<i64: 1, 16>}]} {
    %c0 = arith.constant 0 : index
    %c0_0 = arith.constant 0 : index
    %0 = vector.load %arg1[%c0, %c0_0] : memref<16x16xf32, #tpu.memory_space<vmem>>, vector<16x16xf32>
    %c0_1 = arith.constant 0 : index
    %c0_2 = arith.constant 0 : index
    %1 = vector.load %arg2[%c0_1, %c0_2] : memref<16x32xf32, #tpu.memory_space<vmem>>, vector<16x32xf32>
    %cst = arith.constant dense<0.000000e+00> : vector<16x32xf32>
    %2 = tpu.matmul %0, %1, %cst {dimension_numbers = #tpu.dot_dimension_numbers<[1], [0], [0], [1], [0, 0, 1, 1], [], []>} : vector<16x16xf32>, vector<16x32xf32>, vector<16x32xf32> -> vector<16x32xf32>
    %c0_3 = arith.constant 0 : index
    %c0_4 = arith.constant 0 : index
    %3 = vector.load %arg3[%c0_3, %c0_4] : memref<1x32xf32, #tpu.memory_space<vmem>>, vector<1x32xf32>
    %4 = vector.broadcast %3 : vector<1x32xf32> to vector<16x32xf32>
    %5 = arith.addf %2, %4 : vector<16x32xf32>
    %cst_5 = arith.constant 0.000000e+00 : f32
    %6 = vector.broadcast %cst_5 : f32 to vector<16x32xf32>
    %7 = arith.maximumf %5, %6 : vector<16x32xf32>
    %c0_6 = arith.constant 0 : index
    %c0_7 = arith.constant 0 : index
    %8 = vector.load %arg4[%c0_6, %c0_7] : memref<32x64xf32, #tpu.memory_space<vmem>>, vector<32x64xf32>
    %cst_8 = arith.constant dense<0.000000e+00> : vector<16x64xf32>
    %9 = tpu.matmul %7, %8, %cst_8 {dimension_numbers = #tpu.dot_dimension_numbers<[1], [0], [0], [1], [0, 0, 1, 1], [], []>} : vector<16x32xf32>, vector<32x64xf32>, vector<16x64xf32> -> vector<16x64xf32>
    %c0_9 = arith.constant 0 : index
    %c0_10 = arith.constant 0 : index
    %10 = vector.load %arg5[%c0_9, %c0_10] : memref<1x64xf32, #tpu.memory_space<vmem>>, vector<1x64xf32>
    %11 = vector.broadcast %10 : vector<1x64xf32> to vector<16x64xf32>
    %12 = arith.addf %9, %11 : vector<16x64xf32>
    %cst_11 = arith.constant 0.000000e+00 : f32
    %13 = vector.broadcast %cst_11 : f32 to vector<16x64xf32>
    %14 = arith.maximumf %12, %13 : vector<16x64xf32>
    %c0_12 = arith.constant 0 : index
    %c0_13 = arith.constant 0 : index
    %15 = vector.load %arg6[%c0_12, %c0_13] : memref<64x32xf32, #tpu.memory_space<vmem>>, vector<64x32xf32>
    %cst_14 = arith.constant dense<0.000000e+00> : vector<16x32xf32>
    %16 = tpu.matmul %14, %15, %cst_14 {dimension_numbers = #tpu.dot_dimension_numbers<[1], [0], [0], [1], [0, 0, 1, 1], [], []>} : vector<16x64xf32>, vector<64x32xf32>, vector<16x32xf32> -> vector<16x32xf32>
    %c0_15 = arith.constant 0 : index
    %c0_16 = arith.constant 0 : index
    %17 = vector.load %arg7[%c0_15, %c0_16] : memref<1x32xf32, #tpu.memory_space<vmem>>, vector<1x32xf32>
    %18 = vector.broadcast %17 : vector<1x32xf32> to vector<16x32xf32>
    %19 = arith.addf %16, %18 : vector<16x32xf32>
    %cst_17 = arith.constant 0.000000e+00 : f32
    %20 = vector.broadcast %cst_17 : f32 to vector<16x32xf32>
    %21 = arith.maximumf %19, %20 : vector<16x32xf32>
    %c0_18 = arith.constant 0 : index
    %c0_19 = arith.constant 0 : index
    %22 = vector.load %arg8[%c0_18, %c0_19] : memref<1x32xf32, #tpu.memory_space<vmem>>, vector<1x32xf32>
    "tpu.trace_start"() <{level = 10 : i32, message = "oh,th->ot"}> : () -> ()
    %cst_20 = arith.constant dense<0.000000e+00> : vector<1x16xf32>
    %23 = tpu.matmul %22, %21, %cst_20 {dimension_numbers = #tpu.dot_dimension_numbers<[1], [1], [0], [0], [0, 0, 1, 0], [], []>} : vector<1x32xf32>, vector<16x32xf32>, vector<1x16xf32> -> vector<1x16xf32>
    "tpu.trace_stop"() : () -> ()
    %c0_21 = arith.constant 0 : index
    %c0_22 = arith.constant 0 : index
    %24 = vector.load %arg9[%c0_21, %c0_22] : memref<1x1xf32, #tpu.memory_space<vmem>>, vector<1x1xf32>
    %25 = vector.broadcast %24 : vector<1x1xf32> to vector<1x16xf32>
    %26 = arith.addf %23, %25 : vector<1x16xf32>
    %c0_23 = arith.constant 0 : index
    %c0_24 = arith.constant 0 : index
    %27 = vector.load %arg10[%c0_23, %c0_24] : memref<1x16xf32, #tpu.memory_space<vmem>>, vector<1x16xf32>
    tpu.vector_store %arg10[%c0_23, %c0_24], %26 {strides = array<i32>} : memref<1x16xf32, #tpu.memory_space<vmem>>, vector<1x16xf32>,
    return
  }
  func.func @transform_0(%arg0: i32) -> (i32, i32) {
    %c0_i32 = arith.constant 0 : i32
    %c0_i32_0 = arith.constant 0 : i32
    return %arg0, %c0_i32 : i32, i32
  }
  func.func @transform_1(%arg0: i32) -> (i32, i32) {
    %c0_i32 = arith.constant 0 : i32
    %c0_i32_0 = arith.constant 0 : i32
    %c0_i32_1 = arith.constant 0 : i32
    return %c0_i32, %c0_i32_0 : i32, i32
  }
  func.func @transform_2(%arg0: i32) -> (i32, i32) {
    %c0_i32 = arith.constant 0 : i32
    %c0_i32_0 = arith.constant 0 : i32
    %c0_i32_1 = arith.constant 0 : i32
    return %c0_i32, %c0_i32_0 : i32, i32
  }
  func.func @transform_3(%arg0: i32) -> (i32, i32) {
    %c0_i32 = arith.constant 0 : i32
    %c0_i32_0 = arith.constant 0 : i32
    %c0_i32_1 = arith.constant 0 : i32
    return %c0_i32, %c0_i32_0 : i32, i32
  }
  func.func @transform_4(%arg0: i32) -> (i32, i32) {
    %c0_i32 = arith.constant 0 : i32
    %c0_i32_0 = arith.constant 0 : i32
    %c0_i32_1 = arith.constant 0 : i32
    return %c0_i32, %c0_i32_0 : i32, i32
  }
  func.func @transform_5(%arg0: i32) -> (i32, i32) {
    %c0_i32 = arith.constant 0 : i32
    %c0_i32_0 = arith.constant 0 : i32
    %c0_i32_1 = arith.constant 0 : i32
    return %c0_i32, %c0_i32_0 : i32, i32
  }
  func.func @transform_6(%arg0: i32) -> (i32, i32) {
    %c0_i32 = arith.constant 0 : i32
    %c0_i32_0 = arith.constant 0 : i32
    %c0_i32_1 = arith.constant 0 : i32
    return %c0_i32, %c0_i32_0 : i32, i32
  }
  func.func @transform_7(%arg0: i32) -> (i32, i32) {
    %c0_i32 = arith.constant 0 : i32
    %c0_i32_0 = arith.constant 0 : i32
    %c0_i32_1 = arith.constant 0 : i32
    return %c0_i32, %c0_i32_0 : i32, i32
  }
  func.func @transform_8(%arg0: i32) -> (i32, i32) {
    %c0_i32 = arith.constant 0 : i32
    %c0_i32_0 = arith.constant 0 : i32
    %c0_i32_1 = arith.constant 0 : i32
    return %c0_i32, %c0_i32_0 : i32, i32
  }
  func.func @transform_9(%arg0: i32) -> (i32, i32) {
    %c0_i32 = arith.constant 0 : i32
    %c0_i32_0 = arith.constant 0 : i32
    return %c0_i32, %arg0 : i32, i32
  }
}

module attributes {stable_mosaic.version = 11 : i64} {
  func.func @mlp_kernel(%arg0: i32, %arg1: memref<16x16xf32, #tpu.memory_space<vmem>>, %arg2: memref<16x32xf32, #tpu.memory_space<vmem>>, %arg3: memref<1x32xf32, #tpu.memory_space<vmem>>, %arg4: memref<32x64xf32, #tpu.memory_space<vmem>>, %arg5: memref<1x64xf32, #tpu.memory_space<vmem>>, %arg6: memref<64x32xf32, #tpu.memory_space<vmem>>, %arg7: memref<1x32xf32, #tpu.memory_space<vmem>>, %arg8: memref<1x32xf32, #tpu.memory_space<vmem>>, %arg9: memref<1x1xf32, #tpu.memory_space<vmem>>, %arg10: memref<1x16xf32, #tpu.memory_space<vmem>>) attributes {dimension_semantics = [#tpu.dimension_semantics<parallel>], iteration_bounds = array<i64: 1>, scalar_prefetch = 0 : i64, scratch_operands = 0 : i64, tpu.core_type = #tpu.core_type<tc>, window_params = [{transform_indices = @transform_0, window_bounds = array<i64: 16, 16>}, {pipeline_mode = #tpu.pipeline_mode<synchronous>, transform_indices = @transform_1, window_bounds = array<i64: 16, 32>}, {pipeline_mode = #tpu.pipeline_mode<synchronous>, transform_indices = @transform_2, window_bounds = array<i64: 1, 32>}, {pipeline_mode = #tpu.pipeline_mode<synchronous>, transform_indices = @transform_3, window_bounds = array<i64: 32, 64>}, {pipeline_mode = #tpu.pipeline_mode<synchronous>, transform_indices = @transform_4, window_bounds = array<i64: 1, 64>}, {pipeline_mode = #tpu.pipeline_mode<synchronous>, transform_indices = @transform_5, window_bounds = array<i64: 64, 32>}, {pipeline_mode = #tpu.pipeline_mode<synchronous>, transform_indices = @transform_6, window_bounds = array<i64: 1, 32>}, {pipeline_mode = #tpu.pipeline_mode<synchronous>, transform_indices = @transform_7, window_bounds = array<i64: 1, 32>}, {pipeline_mode = #tpu.pipeline_mode<synchronous>, transform_indices = @transform_8, window_bounds = array<i64: 1, 1>}, {transform_indices = @transform_9, window_bounds = array<i64: 1, 16>}]} {
    %c0 = arith.constant 0 : index
    %c0_0 = arith.constant 0 : index
    %0 = vector.load %arg1[%c0, %c0_0] : memref<16x16xf32, #tpu.memory_space<vmem>>, vector<16x16xf32>
    %c0_1 = arith.constant 0 : index
    %c0_2 = arith.constant 0 : index
    %1 = vector.load %arg2[%c0_1, %c0_2] : memref<16x32xf32, #tpu.memory_space<vmem>>, vector<16x32xf32>
    %cst = arith.constant dense<0.000000e+00> : vector<16x32xf32>
    %2 = tpu.matmul %0, %1, %cst {dimension_numbers = #tpu.dot_dimension_numbers<[1], [0], [0], [1], [0, 0, 1, 1], [], []>} : vector<16x16xf32>, vector<16x32xf32>, vector<16x32xf32> -> vector<16x32xf32>
    %c0_3 = arith.constant 0 : index
    %c0_4 = arith.constant 0 : index
    %3 = vector.load %arg3[%c0_3, %c0_4] : memref<1x32xf32, #tpu.memory_space<vmem>>, vector<1x32xf32>
    %4 = vector.broadcast %3 : vector<1x32xf32> to vector<16x32xf32>
    %5 = arith.addf %2, %4 : vector<16x32xf32>
    %cst_5 = arith.constant 0.000000e+00 : f32
    %6 = vector.broadcast %cst_5 : f32 to vector<16x32xf32>
    %7 = arith.maximumf %5, %6 : vector<16x32xf32>
    %c0_6 = arith.constant 0 : index
    %c0_7 = arith.constant 0 : index
    %8 = vector.load %arg4[%c0_6, %c0_7] : memref<32x64xf32, #tpu.memory_space<vmem>>, vector<32x64xf32>
    %cst_8 = arith.constant dense<0.000000e+00> : vector<16x64xf32>
    %9 = tpu.matmul %7, %8, %cst_8 {dimension_numbers = #tpu.dot_dimension_numbers<[1], [0], [0], [1], [0, 0, 1, 1], [], []>} : vector<16x32xf32>, vector<32x64xf32>, vector<16x64xf32> -> vector<16x64xf32>
    %c0_9 = arith.constant 0 : index
    %c0_10 = arith.constant 0 : index
    %10 = vector.load %arg5[%c0_9, %c0_10] : memref<1x64xf32, #tpu.memory_space<vmem>>, vector<1x64xf32>
    %11 = vector.broadcast %10 : vector<1x64xf32> to vector<16x64xf32>
    %12 = arith.addf %9, %11 : vector<16x64xf32>
    %cst_11 = arith.constant 0.000000e+00 : f32
    %13 = vector.broadcast %cst_11 : f32 to vector<16x64xf32>
    %14 = arith.maximumf %12, %13 : vector<16x64xf32>
    %c0_12 = arith.constant 0 : index
    %c0_13 = arith.constant 0 : index
    %15 = vector.load %arg6[%c0_12, %c0_13] : memref<64x32xf32, #tpu.memory_space<vmem>>, vector<64x32xf32>
    %cst_14 = arith.constant dense<0.000000e+00> : vector<16x32xf32>
    %16 = tpu.matmul %14, %15, %cst_14 {dimension_numbers = #tpu.dot_dimension_numbers<[1], [0], [0], [1], [0, 0, 1, 1], [], []>} : vector<16x64xf32>, vector<64x32xf32>, vector<16x32xf32> -> vector<16x32xf32>
    %c0_15 = arith.constant 0 : index
    %c0_16 = arith.constant 0 : index
    %17 = vector.load %arg7[%c0_15, %c0_16] : memref<1x32xf32, #tpu.memory_space<vmem>>, vector<1x32xf32>
    %18 = vector.broadcast %17 : vector<1x32xf32> to vector<16x32xf32>
    %19 = arith.addf %16, %18 : vector<16x32xf32>
    %cst_17 = arith.constant 0.000000e+00 : f32
    %20 = vector.broadcast %cst_17 : f32 to vector<16x32xf32>
    %21 = arith.maximumf %19, %20 : vector<16x32xf32>
    %c0_18 = arith.constant 0 : index
    %c0_19 = arith.constant 0 : index
    %22 = vector.load %arg8[%c0_18, %c0_19] : memref<1x32xf32, #tpu.memory_space<vmem>>, vector<1x32xf32>
    "tpu.trace_start"() <{level = 10 : i32, message = "oh,th->ot"}> : () -> ()
    %cst_20 = arith.constant dense<0.000000e+00> : vector<1x16xf32>
    %23 = tpu.matmul %22, %21, %cst_20 {dimension_numbers = #tpu.dot_dimension_numbers<[1], [1], [0], [0], [0, 0, 1, 0], [], []>} : vector<1x32xf32>, vector<16x32xf32>, vector<1x16xf32> -> vector<1x16xf32>
    "tpu.trace_stop"() : () -> ()
    %c0_21 = arith.constant 0 : index
    %c0_22 = arith.constant 0 : index
    %24 = vector.load %arg9[%c0_21, %c0_22] : memref<1x1xf32, #tpu.memory_space<vmem>>, vector<1x1xf32>
    %25 = vector.broadcast %24 : vector<1x1xf32> to vector<1x16xf32>
    %26 = arith.addf %23, %25 : vector<1x16xf32>
    %c0_23 = arith.constant 0 : index
    %c0_24 = arith.constant 0 : index
    %27 = vector.load %arg10[%c0_23, %c0_24] : memref<1x16xf32, #tpu.memory_space<vmem>>, vector<1x16xf32>
    tpu.vector_store %arg10[%c0_23, %c0_24], %26 {strides = array<i32>} : memref<1x16xf32, #tpu.memory_space<vmem>>, vector<1x16xf32>,
    return
  }
  func.func @transform_0(%arg0: i32) -> (i32, i32) {
    %c0_i32 = arith.constant 0 : i32
    %c0_i32_0 = arith.constant 0 : i32
    return %arg0, %c0_i32 : i32, i32
  }
  func.func @transform_1(%arg0: i32) -> (i32, i32) {
    %c0_i32 = arith.constant 0 : i32
    %c0_i32_0 = arith.constant 0 : i32
    %c0_i32_1 = arith.constant 0 : i32
    return %c0_i32, %c0_i32_0 : i32, i32
  }
  func.func @transform_2(%arg0: i32) -> (i32, i32) {
    %c0_i32 = arith.constant 0 : i32
    %c0_i32_0 = arith.constant 0 : i32
    %c0_i32_1 = arith.constant 0 : i32
    return %c0_i32, %c0_i32_0 : i32, i32
  }
  func.func @transform_3(%arg0: i32) -> (i32, i32) {
    %c0_i32 = arith.constant 0 : i32
    %c0_i32_0 = arith.constant 0 : i32
    %c0_i32_1 = arith.constant 0 : i32
    return %c0_i32, %c0_i32_0 : i32, i32
  }
  func.func @transform_4(%arg0: i32) -> (i32, i32) {
    %c0_i32 = arith.constant 0 : i32
    %c0_i32_0 = arith.constant 0 : i32
    %c0_i32_1 = arith.constant 0 : i32
    return %c0_i32, %c0_i32_0 : i32, i32
  }
  func.func @transform_5(%arg0: i32) -> (i32, i32) {
    %c0_i32 = arith.constant 0 : i32
    %c0_i32_0 = arith.constant 0 : i32
    %c0_i32_1 = arith.constant 0 : i32
    return %c0_i32, %c0_i32_0 : i32, i32
  }
  func.func @transform_6(%arg0: i32) -> (i32, i32) {
    %c0_i32 = arith.constant 0 : i32
    %c0_i32_0 = arith.constant 0 : i32
    %c0_i32_1 = arith.constant 0 : i32
    return %c0_i32, %c0_i32_0 : i32, i32
  }
  func.func @transform_7(%arg0: i32) -> (i32, i32) {
    %c0_i32 = arith.constant 0 : i32
    %c0_i32_0 = arith.constant 0 : i32
    %c0_i32_1 = arith.constant 0 : i32
    return %c0_i32, %c0_i32_0 : i32, i32
  }
  func.func @transform_8(%arg0: i32) -> (i32, i32) {
    %c0_i32 = arith.constant 0 : i32
    %c0_i32_0 = arith.constant 0 : i32
    %c0_i32_1 = arith.constant 0 : i32
    return %c0_i32, %c0_i32_0 : i32, i32
  }
  func.func @transform_9(%arg0: i32) -> (i32, i32) {
    %c0_i32 = arith.constant 0 : i32
    %c0_i32_0 = arith.constant 0 : i32
    return %c0_i32, %arg0 : i32, i32
  }
}

</mosaic_0001>

<bundles_post_ra>
// kernel: tpu_custom_call.1
= control target key start
LH: loop header
LB: loop body
LE: loop exit
PB: predicated region body
PF: predicated region fallthrough
CT: control target
= control target key end

     0   :  { %s661_s0 = inlined_call_operand.vmem [shape: f32[16,16], index: 0, kind: input, shape index: {}]   ;;  %s662_s1 = inlined_call_operand.vmem [shape: f32[16,32], index: 1, kind: input, shape index: {}]   ;;  %s663_s2 = inlined_call_operand.vmem [shape: f32[1,32], index: 2, kind: input, shape index: {}]   ;;  %s664_s3 = inlined_call_operand.vmem [shape: f32[32,64], index: 3, kind: input, shape index: {}]   ;;  %s665_s4 = inlined_call_operand.vmem [shape: f32[1,64], index: 4, kind: input, shape index: {}]   ;;  %s666_s5 = inlined_call_operand.vmem [shape: f32[64,32], index: 5, kind: input, shape index: {}]   ;;  %s667_s6 = inlined_call_operand.vmem [shape: f32[1,32], index: 6, kind: input, shape index: {}]   ;;  %s668_s7 = inlined_call_operand.vmem [shape: f32[1,32], index: 7, kind: input, shape index: {}]   ;;  %s669_s8 = inlined_call_operand.<no memory space> [shape: f32[1,1], index: 8, kind: input, shape index: {}]   ;;  %s670_s9 = inlined_call_operand.hbm [shape: f32[1,16], index: 9, kind: output, shape index: {}]  }
   0x1   :  { %v14_v0 = vstv %s669_s8 }
   0x2   :  { %15 = vst [vmem:[#allocation2] sm:$0x1] %v14_v0 }
   0x3   :  { %v38_v1 = vld [vmem:[%s662_s1 + $0x8] sm:$0xff]  ;;  %v37_v2 = vld [vmem:[%s662_s1] sm:$0xff]  ;;  %vm46_vm0 = vcmask 130048  }
   0x4   :  { %v35_v3 = vld [vmem:[%s661_s0] sm:$0xff]  ;;  %465 = vmatprep.subr.mxu0 %v38_v1 }
   0x5   :  { %469 = vmatprep.mubr.msk.f32.mxu0 %vm46_vm0, %v35_v3 }
   0x6   :  { %16 = vsyncpa [#allocation4], 0  ;;  %466 = vmatpush3.msra.mxu0 %v38_v1  ;;  %v36_v4 = vld [vmem:[%s661_s0 + $0x8] sm:$0xff]  ;;  %v133_v5 = vld [vmem:[%s664_s3 + $0x18] sm:$0xff]  ;;  %vm141_vm1 = vcmask 261120   ;;  %vm240_vm2 = vcmask 523264   ;;  %v331_v42 = vlaneseq }
   0x7   :  { %467 = vmatprep.subr.mxu0 %v37_v2  ;;  %472 = vmatprep.subr.mxu1 %v133_v5  ;;  %v132_v6 = vld [vmem:[%s664_s3 + $0x10] sm:$0xff]  ;;  %v131_v7 = vld [vmem:[%s664_s3 + $0x8] sm:$0xff]  ;;  %v130_v8 = vld [vmem:[%s664_s3] sm:$0xff]  ;;  %v536_v31 = vmov 0.0   ;;  %vm537_vm3 = vmmov 0   ;;  %v538_v33 = vmov 0  }
   0x8   :  { %468 = vmatpush3.msra.mxu0 %v37_v2  ;;  %473 = vmatpush3.msra.mxu1 %v133_v5  ;;  %v232_v9 = vld [vmem:[%s666_s5 + $0x38] sm:$0xff]  ;;  %v231_v10 = vld [vmem:[%s666_s5 + $0x30] sm:$0xff]  ;;  %v230_v11 = vld [vmem:[%s666_s5 + $0x28] sm:$0xff]  ;;  %v332_v43 = vshrl.u32 %v331_v42, 7  ;;  %vm414_vm4 = vcmask 122880  }
   0x9   :  { %470 = vmatmul.mubr.msk.f32.vlgmr.msra.gmra.mxu0 %vm46_vm0, %v36_v4  ;;  %474 = vmatprep.subr.mxu1 %v132_v6  ;;  %v229_v12 = vld [vmem:[%s666_s5 + $0x20] sm:$0xff]  ;;  %v228_v20 = vld [vmem:[%s666_s5 + $0x18] sm:$0xff]  ;;  %v227_v21 = vld [vmem:[%s666_s5 + $0x10] sm:$0xff] }
   0xa   :  { %475 = vmatpush3.msra.mxu1 %v132_v6  ;;  %483 = vmatprep.subr.mxu0 %v232_v9  ;;  %v430_v13 = vld [vmem:[%s663_s2] ss:$0 sm:$0xff]  ;;  %v226_v22 = vld [vmem:[%s666_s5 + $0x8] sm:$0xff]  ;;  %v333_v44 = vsub.s32 0, %v332_v43 }
   0xb   :  { %476 = vmatprep.subr.mxu1 %v131_v7  ;;  %484 = vmatpush3.msra.mxu0 %v232_v9  ;;  %v225_v23 = vld [vmem:[%s666_s5] sm:$0xff] }
   0xc   :  { %477 = vmatpush3.msra.mxu1 %v131_v7  ;;  %485 = vmatprep.subr.mxu0 %v231_v10  ;;  %v433_v24 = vld [vmem:[%s665_s4] ss:$0 sm:$0xff] }
   0xd   :  { %478 = vmatprep.subr.mxu1 %v130_v8  ;;  %486 = vmatpush3.msra.mxu0 %v231_v10  ;;  %v325_v32 = vld [vmem:[#allocation2] sm:$0x1] }
   0xe   :  { %479 = vmatpush3.msra.mxu1 %v130_v8  ;;  %487 = vmatprep.subr.mxu0 %v230_v11  ;;  %v436_v34 = vld [vmem:[%s667_s6] ss:$0 sm:$0xff]  ;;  %s539_s6 = smov [#allocation3]  }
   0xf   :  { %488 = vmatpush3.msra.mxu0 %v230_v11  ;;  %502 = vmatprep.subr.mxu1 %v536_v31  ;;  %v324_v41 = vld [vmem:[%s668_s7] sm:$0x1]  ;;  %s422_s21 = sshll.u32 %s539_s6, 4  ;;  %s423_s21 = int_to_ptr.vmem [resolvable:$true] %s422_s21 }
  0x10   :  { %489 = vmatprep.subr.mxu0 %v229_v12  ;;  %513 = vset.pattern.permute.xlu0 %v538_v33  ;;  %s514_s22 = scalar_lea.vmem %s423_s21, 16  ;;  %s518_s0 = scalar_lea.vmem %s423_s21, 32 }
  0x11   :  { %490 = vmatpush3.msra.mxu0 %v229_v12  ;;  %328 = vperm.xlu0 %513, %v325_v32   ;;  %p515_p0 = scmp.ne.s32.totalorder %s423_s21, %s514_s22  ;;  %p519_p1 = scmp.lt.s32.totalorder %s423_s21, %s423_s21 }
  0x12   :  { %491 = vmatprep.subr.mxu0 %v228_v20  ;;  %p520_p2 = scmp.lt.s32.totalorder %s518_s0, %s514_s22 }
  0x13   :  { %492 = vmatpush3.msra.mxu0 %v228_v20 }
  0x14   :  { %493 = vmatprep.subr.mxu0 %v227_v21  ;;  %p521_p3 = por %p520_p2, %p519_p1 }
  0x15   :  { %494 = vmatpush3.msra.mxu0 %v227_v21 }
  0x16   :  { %495 = vmatprep.subr.mxu0 %v226_v22  ;;  %p522_p4 = pnand %p521_p3, %p515_p0 }
  0x17   :  { %496 = vmatpush3.msra.mxu0 %v226_v22 }
  0x18   :  { %497 = vmatprep.subr.mxu0 %v225_v23 }
  0x19   :  { %498 = vmatpush3.msra.mxu0 %v225_v23 }
  0x8c   :  { %v329_v45 = vpop.permute.xlu0 %328 }
  0x8d   :  { %v334_v46 = vrot.slane %v329_v45, %v333_v44 }
  0xc9   :  { %v471_v14 = vpop.f32.mrf.mxu0 }
  0xca   :  { %v125_v15 = vadd.f32 %v471_v14, %v430_v13 }
  0xcb   :  { %v119_v16 = vpop.f32.mrf.mxu0 }
  0xcc   :  { %v120_v17 = vadd.f32 %v430_v13, %v119_v16  ;;  %v129_v19 = vmax.f32 %v125_v15, 0.0 }
  0xce   :  { %v128_v18 = vmax.f32 %v120_v17, 0.0 }
  0xd0   :  { %480 = vmatprep.mubr.msk.f32.mxu1 %vm141_vm1, %v128_v18 }
  0xd1   :  { %481 = vmatmul.mubr.msk.f32.vlgmr.msra.gmra.mxu1 %vm141_vm1, %v129_v19 }
  0xd2   :  { %506 = vmatprep.mubr.msk.f32.mxu1 %vm537_vm3, %v536_v31 }
 0x191   :  { %v482_v25 = vpop.f32.mrf.mxu1 }
 0x192   :  { %v220_v26 = vadd.f32 %v482_v25, %v433_v24 }
 0x193   :  { %v214_v27 = vpop.f32.mrf.mxu1 }
 0x194   :  { %v215_v28 = vadd.f32 %v433_v24, %v214_v27  ;;  %v224_v30 = vmax.f32 %v220_v26, 0.0 }
 0x196   :  { %v223_v29 = vmax.f32 %v215_v28, 0.0 }
 0x198   :  { %499 = vmatprep.mubr.msk.f32.mxu0 %vm240_vm2, %v223_v29 }
 0x199   :  { %500 = vmatmul.mubr.msk.f32.vlgmr.msra.gmra.mxu0 %vm240_vm2, %v224_v30 }
 0x259   :  { %v501_v35 = vpop.f32.mrf.mxu0 }
 0x25a   :  { %v319_v36 = vadd.f32 %v501_v35, %v436_v34 }
 0x25b   :  { %v313_v37 = vpop.f32.mrf.mxu0 }
 0x25c   :  { %v323_v38 = vmax.f32 %v319_v36, 0.0  ;;  %v314_v39 = vadd.f32 %v436_v34, %v313_v37 }
 0x25e   :  { %503 = vmatpush3.xpose.msk.msra.mxu1 %vm141_vm1, %v323_v38  ;;  %v322_v40 = vmax.f32 %v314_v39, 0.0 }
 0x25f   :  { %504 = vmatprep.subr.mxu1 %v536_v31 }
 0x262   :  { %505 = vmatpush3.xpose.msk.msra.mxu1 %vm141_vm1, %v322_v40 }
 0x265   :  { %507 = vmatmul.mubr.msk.f32.vlgmr.msra.gmra.mxu1 %vm141_vm1, %v324_v41 }
 0x325   :  { %v410_v47 = vpop.f32.mrf.mxu1 }
 0x326   :  { %v411_v48 = vadd.f32 %v410_v47, %v334_v46 }
 0x327   :  { %v508_v49 = vpop.f32.mrf.mxu1 }
 0x328   :  { %415 = vst.msk [vmem:[#allocation3] sm:$0x1] %vm414_vm4, %v411_v48 }
 0x329   :  { %525 = shalt.err (!%p522_p4)
}
 0x32a   :  { %425 = dma.vmem_to_hbm [thread:$0]  %s423_s21, 16, %s670_s9, [#allocation4]  }
 0x32b   :  { %534 = dma.done.wait [#allocation4], 16  }
 0x32c   :  { %535 = vsyncadd [#allocation4], 4294967280 }
 0x32d   :  { %429 = vsyncpa [#allocation4], 1 }

// kernel: tpu_custom_call.1
= control target key start
LH: loop header
LB: loop body
LE: loop exit
PB: predicated region body
PF: predicated region fallthrough
CT: control target
= control target key end

     0   :  { %s661_s0 = inlined_call_operand.vmem [shape: f32[16,16], index: 0, kind: input, shape index: {}]   ;;  %s662_s1 = inlined_call_operand.vmem [shape: f32[16,32], index: 1, kind: input, shape index: {}]   ;;  %s663_s2 = inlined_call_operand.vmem [shape: f32[1,32], index: 2, kind: input, shape index: {}]   ;;  %s664_s3 = inlined_call_operand.vmem [shape: f32[32,64], index: 3, kind: input, shape index: {}]   ;;  %s665_s4 = inlined_call_operand.vmem [shape: f32[1,64], index: 4, kind: input, shape index: {}]   ;;  %s666_s5 = inlined_call_operand.vmem [shape: f32[64,32], index: 5, kind: input, shape index: {}]   ;;  %s667_s6 = inlined_call_operand.vmem [shape: f32[1,32], index: 6, kind: input, shape index: {}]   ;;  %s668_s7 = inlined_call_operand.vmem [shape: f32[1,32], index: 7, kind: input, shape index: {}]   ;;  %s669_s8 = inlined_call_operand.<no memory space> [shape: f32[1,1], index: 8, kind: input, shape index: {}]   ;;  %s670_s9 = inlined_call_operand.hbm [shape: f32[1,16], index: 9, kind: output, shape index: {}]  }
   0x1   :  { %v14_v0 = vstv %s669_s8 }
   0x2   :  { %15 = vst [vmem:[#allocation2] sm:$0x1] %v14_v0 }
   0x3   :  { %v38_v1 = vld [vmem:[%s662_s1 + $0x8] sm:$0xff]  ;;  %v37_v2 = vld [vmem:[%s662_s1] sm:$0xff]  ;;  %vm46_vm0 = vcmask 130048  }
   0x4   :  { %v35_v3 = vld [vmem:[%s661_s0] sm:$0xff]  ;;  %465 = vmatprep.subr.mxu0 %v38_v1 }
   0x5   :  { %469 = vmatprep.mubr.msk.f32.mxu0 %vm46_vm0, %v35_v3 }
   0x6   :  { %16 = vsyncpa [#allocation4], 0  ;;  %466 = vmatpush3.msra.mxu0 %v38_v1  ;;  %v36_v4 = vld [vmem:[%s661_s0 + $0x8] sm:$0xff]  ;;  %v133_v5 = vld [vmem:[%s664_s3 + $0x18] sm:$0xff]  ;;  %vm141_vm1 = vcmask 261120   ;;  %vm240_vm2 = vcmask 523264   ;;  %v331_v42 = vlaneseq }
   0x7   :  { %467 = vmatprep.subr.mxu0 %v37_v2  ;;  %472 = vmatprep.subr.mxu1 %v133_v5  ;;  %v132_v6 = vld [vmem:[%s664_s3 + $0x10] sm:$0xff]  ;;  %v131_v7 = vld [vmem:[%s664_s3 + $0x8] sm:$0xff]  ;;  %v130_v8 = vld [vmem:[%s664_s3] sm:$0xff]  ;;  %v536_v31 = vmov 0.0   ;;  %vm537_vm3 = vmmov 0   ;;  %v538_v33 = vmov 0  }
   0x8   :  { %468 = vmatpush3.msra.mxu0 %v37_v2  ;;  %473 = vmatpush3.msra.mxu1 %v133_v5  ;;  %v232_v9 = vld [vmem:[%s666_s5 + $0x38] sm:$0xff]  ;;  %v231_v10 = vld [vmem:[%s666_s5 + $0x30] sm:$0xff]  ;;  %v230_v11 = vld [vmem:[%s666_s5 + $0x28] sm:$0xff]  ;;  %v332_v43 = vshrl.u32 %v331_v42, 7  ;;  %vm414_vm4 = vcmask 122880  }
   0x9   :  { %470 = vmatmul.mubr.msk.f32.vlgmr.msra.gmra.mxu0 %vm46_vm0, %v36_v4  ;;  %474 = vmatprep.subr.mxu1 %v132_v6  ;;  %v229_v12 = vld [vmem:[%s666_s5 + $0x20] sm:$0xff]  ;;  %v228_v20 = vld [vmem:[%s666_s5 + $0x18] sm:$0xff]  ;;  %v227_v21 = vld [vmem:[%s666_s5 + $0x10] sm:$0xff] }
   0xa   :  { %475 = vmatpush3.msra.mxu1 %v132_v6  ;;  %483 = vmatprep.subr.mxu0 %v232_v9  ;;  %v430_v13 = vld [vmem:[%s663_s2] ss:$0 sm:$0xff]  ;;  %v226_v22 = vld [vmem:[%s666_s5 + $0x8] sm:$0xff]  ;;  %v333_v44 = vsub.s32 0, %v332_v43 }
   0xb   :  { %476 = vmatprep.subr.mxu1 %v131_v7  ;;  %484 = vmatpush3.msra.mxu0 %v232_v9  ;;  %v225_v23 = vld [vmem:[%s666_s5] sm:$0xff] }
   0xc   :  { %477 = vmatpush3.msra.mxu1 %v131_v7  ;;  %485 = vmatprep.subr.mxu0 %v231_v10  ;;  %v433_v24 = vld [vmem:[%s665_s4] ss:$0 sm:$0xff] }
   0xd   :  { %478 = vmatprep.subr.mxu1 %v130_v8  ;;  %486 = vmatpush3.msra.mxu0 %v231_v10  ;;  %v325_v32 = vld [vmem:[#allocation2] sm:$0x1] }
   0xe   :  { %479 = vmatpush3.msra.mxu1 %v130_v8  ;;  %487 = vmatprep.subr.mxu0 %v230_v11  ;;  %v436_v34 = vld [vmem:[%s667_s6] ss:$0 sm:$0xff]  ;;  %s539_s6 = smov [#allocation3]  }
   0xf   :  { %488 = vmatpush3.msra.mxu0 %v230_v11  ;;  %502 = vmatprep.subr.mxu1 %v536_v31  ;;  %v324_v41 = vld [vmem:[%s668_s7] sm:$0x1]  ;;  %s422_s21 = sshll.u32 %s539_s6, 4  ;;  %s423_s21 = int_to_ptr.vmem [resolvable:$true] %s422_s21 }
  0x10   :  { %489 = vmatprep.subr.mxu0 %v229_v12  ;;  %513 = vset.pattern.permute.xlu0 %v538_v33  ;;  %s514_s22 = scalar_lea.vmem %s423_s21, 16  ;;  %s518_s0 = scalar_lea.vmem %s423_s21, 32 }
  0x11   :  { %490 = vmatpush3.msra.mxu0 %v229_v12  ;;  %328 = vperm.xlu0 %513, %v325_v32   ;;  %p515_p0 = scmp.ne.s32.totalorder %s423_s21, %s514_s22  ;;  %p519_p1 = scmp.lt.s32.totalorder %s423_s21, %s423_s21 }
  0x12   :  { %491 = vmatprep.subr.mxu0 %v228_v20  ;;  %p520_p2 = scmp.lt.s32.totalorder %s518_s0, %s514_s22 }
  0x13   :  { %492 = vmatpush3.msra.mxu0 %v228_v20 }
  0x14   :  { %493 = vmatprep.subr.mxu0 %v227_v21  ;;  %p521_p3 = por %p520_p2, %p519_p1 }
  0x15   :  { %494 = vmatpush3.msra.mxu0 %v227_v21 }
  0x16   :  { %495 = vmatprep.subr.mxu0 %v226_v22  ;;  %p522_p4 = pnand %p521_p3, %p515_p0 }
  0x17   :  { %496 = vmatpush3.msra.mxu0 %v226_v22 }
  0x18   :  { %497 = vmatprep.subr.mxu0 %v225_v23 }
  0x19   :  { %498 = vmatpush3.msra.mxu0 %v225_v23 }
  0x8c   :  { %v329_v45 = vpop.permute.xlu0 %328 }
  0x8d   :  { %v334_v46 = vrot.slane %v329_v45, %v333_v44 }
  0xc9   :  { %v471_v14 = vpop.f32.mrf.mxu0 }
  0xca   :  { %v125_v15 = vadd.f32 %v471_v14, %v430_v13 }
  0xcb   :  { %v119_v16 = vpop.f32.mrf.mxu0 }
  0xcc   :  { %v120_v17 = vadd.f32 %v430_v13, %v119_v16  ;;  %v129_v19 = vmax.f32 %v125_v15, 0.0 }
  0xce   :  { %v128_v18 = vmax.f32 %v120_v17, 0.0 }
  0xd0   :  { %480 = vmatprep.mubr.msk.f32.mxu1 %vm141_vm1, %v128_v18 }
  0xd1   :  { %481 = vmatmul.mubr.msk.f32.vlgmr.msra.gmra.mxu1 %vm141_vm1, %v129_v19 }
  0xd2   :  { %506 = vmatprep.mubr.msk.f32.mxu1 %vm537_vm3, %v536_v31 }
 0x191   :  { %v482_v25 = vpop.f32.mrf.mxu1 }
 0x192   :  { %v220_v26 = vadd.f32 %v482_v25, %v433_v24 }
 0x193   :  { %v214_v27 = vpop.f32.mrf.mxu1 }
 0x194   :  { %v215_v28 = vadd.f32 %v433_v24, %v214_v27  ;;  %v224_v30 = vmax.f32 %v220_v26, 0.0 }
 0x196   :  { %v223_v29 = vmax.f32 %v215_v28, 0.0 }
 0x198   :  { %499 = vmatprep.mubr.msk.f32.mxu0 %vm240_vm2, %v223_v29 }
 0x199   :  { %500 = vmatmul.mubr.msk.f32.vlgmr.msra.gmra.mxu0 %vm240_vm2, %v224_v30 }
 0x259   :  { %v501_v35 = vpop.f32.mrf.mxu0 }
 0x25a   :  { %v319_v36 = vadd.f32 %v501_v35, %v436_v34 }
 0x25b   :  { %v313_v37 = vpop.f32.mrf.mxu0 }
 0x25c   :  { %v323_v38 = vmax.f32 %v319_v36, 0.0  ;;  %v314_v39 = vadd.f32 %v436_v34, %v313_v37 }
 0x25e   :  { %503 = vmatpush3.xpose.msk.msra.mxu1 %vm141_vm1, %v323_v38  ;;  %v322_v40 = vmax.f32 %v314_v39, 0.0 }
 0x25f   :  { %504 = vmatprep.subr.mxu1 %v536_v31 }
 0x262   :  { %505 = vmatpush3.xpose.msk.msra.mxu1 %vm141_vm1, %v322_v40 }
 0x265   :  { %507 = vmatmul.mubr.msk.f32.vlgmr.msra.gmra.mxu1 %vm141_vm1, %v324_v41 }
 0x325   :  { %v410_v47 = vpop.f32.mrf.mxu1 }
 0x326   :  { %v411_v48 = vadd.f32 %v410_v47, %v334_v46 }
 0x327   :  { %v508_v49 = vpop.f32.mrf.mxu1 }
 0x328   :  { %415 = vst.msk [vmem:[#allocation3] sm:$0x1] %vm414_vm4, %v411_v48 }
 0x329   :  { %525 = shalt.err (!%p522_p4)
}
 0x32a   :  { %425 = dma.vmem_to_hbm [thread:$0]  %s423_s21, 16, %s670_s9, [#allocation4]  }
 0x32b   :  { %534 = dma.done.wait [#allocation4], 16  }
 0x32c   :  { %535 = vsyncadd [#allocation4], 4294967280 }
 0x32d   :  { %429 = vsyncpa [#allocation4], 1 }

</bundles_post_ra>
